<compile_context>
chip_gen: v7x
topology: tpu7x:2x2x1
jax: 0.10.0
libtpu: 0.0.40
codegen_flags: <defaults>
</compile_context>

<pallas_src>
import jax
import jax.numpy as jnp
from jax.experimental import pallas as pl
from jax.experimental.pallas import tpu as pltpu

NUM_FEATURES = 20
HIDDEN1 = 64
HIDDEN2 = 32
NUM_CLASSES = 3
PADDED_CLASSES = 8        # narrow zero-padded output width (was 128)
DEFAULT_TILE_B = 2048     # batch rows per grid step (swept per review guidance)
MIN_SPLIT_BATCH = 256     # above this, force >=2 grid steps (v7x 2-TC sharding)


def mlp_kernel(x_ref, w1_ref, b1_ref, w2_ref, b2_ref, w3_ref, b3_ref, o_ref):
    # Weights/biases are VMEM-resident (same block every grid step); only the
    # x tile and the output tile stream through HBM.
    x = x_ref[...].astype(jnp.bfloat16)

    h1 = jnp.dot(x, w1_ref[...], preferred_element_type=jnp.float32) + b1_ref[...]
    h1 = jnp.maximum(h1, 0.0).astype(jnp.bfloat16)

    h2 = jnp.dot(h1, w2_ref[...], preferred_element_type=jnp.float32) + b2_ref[...]
    h2 = jnp.maximum(h2, 0.0).astype(jnp.bfloat16)

    out = jnp.dot(h2, w3_ref[...], preferred_element_type=jnp.float32) + b3_ref[...]
    o_ref[...] = out.astype(jnp.bfloat16)   # (tile_b, 8) narrow bf16 store


def simple_nn_forward(x, params, tile_b=DEFAULT_TILE_B):
    w1, b1, w2, b2, w3, b3 = params
    batch = x.shape[0]

    # Batch tile: multiple of 8 sublanes, no larger than the (rounded-up) batch.
    rounded_batch = max(8, pl.cdiv(batch, 8) * 8)
    tile_b = min(tile_b, rounded_batch)
    # For mid/large batches, ensure >= 2 grid steps so the "parallel" batch axis can
    # shard across v7x's two TensorCores (costs ~0.35 us extra on single-TC chips).
    if rounded_batch > MIN_SPLIT_BATCH:
        half = pl.cdiv(pl.cdiv(rounded_batch, 2), 8) * 8
        tile_b = min(tile_b, half)

    padded_batch = pl.cdiv(batch, tile_b) * tile_b
    if padded_batch != batch:
        x = jnp.pad(x, ((0, padded_batch - batch), (0, 0)))

    grid = (padded_batch // tile_b,)
    resident = lambda i: (0, 0)    # weights / biases: same block every step
    streamed = lambda i: (i, 0)    # x / out: tile i of the batch

    flops = 2 * padded_batch * (NUM_FEATURES * HIDDEN1
                                + HIDDEN1 * HIDDEN2
                                + HIDDEN2 * PADDED_CLASSES)
    bytes_accessed = (padded_batch * NUM_FEATURES * 4        # x stream (f32 read)
                      + padded_batch * PADDED_CLASSES * 2    # out stream (bf16 write)
                      + (w1.size + w2.size + w3.size) * 2    # bf16 weights
                      + (b1.size + b2.size + b3.size) * 4)   # f32 biases

    out = pl.pallas_call(
        mlp_kernel,
        out_shape=jax.ShapeDtypeStruct((padded_batch, PADDED_CLASSES), jnp.bfloat16),
        grid=grid,
        in_specs=[
            pl.BlockSpec((tile_b, NUM_FEATURES), streamed),
            pl.BlockSpec((NUM_FEATURES, HIDDEN1), resident),
            pl.BlockSpec((1, HIDDEN1), resident),
            pl.BlockSpec((HIDDEN1, HIDDEN2), resident),
            pl.BlockSpec((1, HIDDEN2), resident),
            pl.BlockSpec((HIDDEN2, PADDED_CLASSES), resident),
            pl.BlockSpec((1, PADDED_CLASSES), resident),
        ],
        out_specs=pl.BlockSpec((tile_b, PADDED_CLASSES), streamed),
        compiler_params=pltpu.CompilerParams(
            dimension_semantics=("parallel",),      # shard batch tiles over v7x's 2 TCs
            vmem_limit_bytes=64 * 1024 * 1024,      # headroom beyond v5e's 16 MiB default
        ),
        cost_estimate=pl.CostEstimate(
            flops=flops, transcendentals=0, bytes_accessed=bytes_accessed),
    )(x, w1, b1, w2, b2, w3, b3)

    # Slice off row padding + zero-padded classes; restore caller-visible f32 logits.
    return out[:batch, :NUM_CLASSES].astype(jnp.float32)


def init_params(key):
    """PyTorch nn.Linear-style init (U(-1/sqrt(fan_in), +bound)).

    Weights are stored [in, out] (transposed vs torch, so the kernel computes
    x @ W) and cast to bf16 for the MXU; biases stay f32 and shaped (1, out).
    The final layer is zero-padded from 3 to 8 output columns; padded columns
    stay exact zeros (zero weight columns, zero bias, no activation after fc3).
    """
    def linear(key, fan_in, fan_out, pad_out=None):
        kw, kb = jax.random.split(key)
        bound = 1.0 / jnp.sqrt(float(fan_in))
        w = jax.random.uniform(kw, (fan_in, fan_out), jnp.float32, -bound, bound)
        b = jax.random.uniform(kb, (1, fan_out), jnp.float32, -bound, bound)
        if pad_out is not None and pad_out > fan_out:
            w = jnp.pad(w, ((0, 0), (0, pad_out - fan_out)))
            b = jnp.pad(b, ((0, 0), (0, pad_out - fan_out)))
        return w.astype(jnp.bfloat16), b

    k1, k2, k3 = jax.random.split(key, 3)
    w1, b1 = linear(k1, NUM_FEATURES, HIDDEN1)
    w2, b2 = linear(k2, HIDDEN1, HIDDEN2)
    w3, b3 = linear(k3, HIDDEN2, NUM_CLASSES, pad_out=PADDED_CLASSES)
    return (w1, b1, w2, b2, w3, b3)


def ref_forward(x, params):
    """Pure-JAX reference of the same math (bf16 operands, f32 accumulate)."""
    w1, b1, w2, b2, w3, b3 = params
    h1 = jnp.maximum(
        jnp.dot(x.astype(jnp.bfloat16), w1, preferred_element_type=jnp.float32) + b1, 0.0)
    h2 = jnp.maximum(
        jnp.dot(h1.astype(jnp.bfloat16), w2, preferred_element_type=jnp.float32) + b2, 0.0)
    out = jnp.dot(h2.astype(jnp.bfloat16), w3, preferred_element_type=jnp.float32) + b3
    return out[:, :NUM_CLASSES]


if __name__ == "__main__":
    key = jax.random.PRNGKey(0)
    k_params, k_x1, k_x2, k_x3 = jax.random.split(key, 4)
    params = init_params(k_params)

    # Small check: batch=8 (single grid step).
    x8 = jax.random.normal(k_x1, (8, NUM_FEATURES), jnp.float32)
    out8 = simple_nn_forward(x8, params)
    jax.block_until_ready(out8)
    assert out8.shape == (8, NUM_CLASSES)
    assert jnp.allclose(out8, ref_forward(x8, params), atol=2e-2, rtol=2e-2)

    # Ragged batch check: exercises row padding + output slicing.
    x13 = jax.random.normal(k_x2, (13, NUM_FEATURES), jnp.float32)
    out13 = simple_nn_forward(x13, params)
    jax.block_until_ready(out13)
    assert out13.shape == (13, NUM_CLASSES)
    assert jnp.allclose(out13, ref_forward(x13, params), atol=2e-2, rtol=2e-2)

    # Multi-tile check: batch > 256 splits into >= 2 grid steps (v7x sharding path).
    x384 = jax.random.normal(k_x3, (384, NUM_FEATURES), jnp.float32)
    out384 = simple_nn_forward(x384, params)
    jax.block_until_ready(out384)
    assert out384.shape == (384, NUM_CLASSES)
    assert jnp.allclose(out384, ref_forward(x384, params), atol=2e-2, rtol=2e-2)

    print("KERNEL_OK")
</pallas_src>

<mosaic_0001>
module attributes {stable_mosaic.version = 11 : i64} {
  func.func @mlp_kernel(%arg0: i32, %arg1: memref<8x20xf32, #tpu.memory_space<vmem>>, %arg2: memref<20x64xbf16, #tpu.memory_space<vmem>>, %arg3: memref<1x64xf32, #tpu.memory_space<vmem>>, %arg4: memref<64x32xbf16, #tpu.memory_space<vmem>>, %arg5: memref<1x32xf32, #tpu.memory_space<vmem>>, %arg6: memref<32x8xbf16, #tpu.memory_space<vmem>>, %arg7: memref<1x8xf32, #tpu.memory_space<vmem>>, %arg8: memref<8x8xbf16, #tpu.memory_space<vmem>>) attributes {dimension_semantics = [#tpu.dimension_semantics<parallel>], iteration_bounds = array<i64: 1>, scalar_prefetch = 0 : i64, scratch_operands = 0 : i64, tpu.core_type = #tpu.core_type<tc>, window_params = [{transform_indices = @transform_0, window_bounds = array<i64: 8, 20>}, {pipeline_mode = #tpu.pipeline_mode<synchronous>, transform_indices = @transform_1, window_bounds = array<i64: 20, 64>}, {pipeline_mode = #tpu.pipeline_mode<synchronous>, transform_indices = @transform_2, window_bounds = array<i64: 1, 64>}, {pipeline_mode = #tpu.pipeline_mode<synchronous>, transform_indices = @transform_3, window_bounds = array<i64: 64, 32>}, {pipeline_mode = #tpu.pipeline_mode<synchronous>, transform_indices = @transform_4, window_bounds = array<i64: 1, 32>}, {pipeline_mode = #tpu.pipeline_mode<synchronous>, transform_indices = @transform_5, window_bounds = array<i64: 32, 8>}, {pipeline_mode = #tpu.pipeline_mode<synchronous>, transform_indices = @transform_6, window_bounds = array<i64: 1, 8>}, {transform_indices = @transform_7, window_bounds = array<i64: 8, 8>}]} {
    %c0 = arith.constant 0 : index
    %c0_0 = arith.constant 0 : index
    %0 = vector.load %arg1[%c0, %c0_0] : memref<8x20xf32, #tpu.memory_space<vmem>>, vector<8x20xf32>
    %1 = arith.truncf %0 : vector<8x20xf32> to vector<8x20xbf16>
    %c0_1 = arith.constant 0 : index
    %c0_2 = arith.constant 0 : index
    %2 = vector.load %arg2[%c0_1, %c0_2] : memref<20x64xbf16, #tpu.memory_space<vmem>>, vector<20x64xbf16>
    %cst = arith.constant dense<0.000000e+00> : vector<8x64xf32>
    %3 = tpu.matmul %1, %2, %cst {dimension_numbers = #tpu.dot_dimension_numbers<[1], [0], [0], [1], [0, 0, 1, 1], [], []>} : vector<8x20xbf16>, vector<20x64xbf16>, vector<8x64xf32> -> vector<8x64xf32>
    %c0_3 = arith.constant 0 : index
    %c0_4 = arith.constant 0 : index
    %4 = vector.load %arg3[%c0_3, %c0_4] : memref<1x64xf32, #tpu.memory_space<vmem>>, vector<1x64xf32>
    %5 = vector.broadcast %4 : vector<1x64xf32> to vector<8x64xf32>
    %6 = arith.addf %3, %5 : vector<8x64xf32>
    %cst_5 = arith.constant 0.000000e+00 : f32
    %7 = vector.broadcast %cst_5 : f32 to vector<8x64xf32>
    %8 = arith.maximumf %6, %7 : vector<8x64xf32>
    %9 = arith.truncf %8 : vector<8x64xf32> to vector<8x64xbf16>
    %c0_6 = arith.constant 0 : index
    %c0_7 = arith.constant 0 : index
    %10 = vector.load %arg4[%c0_6, %c0_7] : memref<64x32xbf16, #tpu.memory_space<vmem>>, vector<64x32xbf16>
    %cst_8 = arith.constant dense<0.000000e+00> : vector<8x32xf32>
    %11 = tpu.matmul %9, %10, %cst_8 {dimension_numbers = #tpu.dot_dimension_numbers<[1], [0], [0], [1], [0, 0, 1, 1], [], []>} : vector<8x64xbf16>, vector<64x32xbf16>, vector<8x32xf32> -> vector<8x32xf32>
    %c0_9 = arith.constant 0 : index
    %c0_10 = arith.constant 0 : index
    %12 = vector.load %arg5[%c0_9, %c0_10] : memref<1x32xf32, #tpu.memory_space<vmem>>, vector<1x32xf32>
    %13 = vector.broadcast %12 : vector<1x32xf32> to vector<8x32xf32>
    %14 = arith.addf %11, %13 : vector<8x32xf32>
    %cst_11 = arith.constant 0.000000e+00 : f32
    %15 = vector.broadcast %cst_11 : f32 to vector<8x32xf32>
    %16 = arith.maximumf %14, %15 : vector<8x32xf32>
    %17 = arith.truncf %16 : vector<8x32xf32> to vector<8x32xbf16>
    %c0_12 = arith.constant 0 : index
    %c0_13 = arith.constant 0 : index
    %18 = vector.load %arg6[%c0_12, %c0_13] : memref<32x8xbf16, #tpu.memory_space<vmem>>, vector<32x8xbf16>
    %cst_14 = arith.constant dense<0.000000e+00> : vector<8x8xf32>
    %19 = tpu.matmul %17, %18, %cst_14 {dimension_numbers = #tpu.dot_dimension_numbers<[1], [0], [0], [1], [0, 0, 1, 1], [], []>} : vector<8x32xbf16>, vector<32x8xbf16>, vector<8x8xf32> -> vector<8x8xf32>
    %c0_15 = arith.constant 0 : index
    %c0_16 = arith.constant 0 : index
    %20 = vector.load %arg7[%c0_15, %c0_16] : memref<1x8xf32, #tpu.memory_space<vmem>>, vector<1x8xf32>
    %21 = vector.broadcast %20 : vector<1x8xf32> to vector<8x8xf32>
    %22 = arith.addf %19, %21 : vector<8x8xf32>
    %23 = arith.truncf %22 : vector<8x8xf32> to vector<8x8xbf16>
    %c0_17 = arith.constant 0 : index
    %c0_18 = arith.constant 0 : index
    %24 = vector.load %arg8[%c0_17, %c0_18] : memref<8x8xbf16, #tpu.memory_space<vmem>>, vector<8x8xbf16>
    tpu.vector_store %arg8[%c0_17, %c0_18], %23 {strides = array<i32>} : memref<8x8xbf16, #tpu.memory_space<vmem>>, vector<8x8xbf16>,
    return
  }
  func.func @transform_0(%arg0: i32) -> (i32, i32) {
    %c0_i32 = arith.constant 0 : i32
    %c0_i32_0 = arith.constant 0 : i32
    return %arg0, %c0_i32 : i32, i32
  }
  func.func @transform_1(%arg0: i32) -> (i32, i32) {
    %c0_i32 = arith.constant 0 : i32
    %c0_i32_0 = arith.constant 0 : i32
    %c0_i32_1 = arith.constant 0 : i32
    return %c0_i32, %c0_i32_0 : i32, i32
  }
  func.func @transform_2(%arg0: i32) -> (i32, i32) {
    %c0_i32 = arith.constant 0 : i32
    %c0_i32_0 = arith.constant 0 : i32
    %c0_i32_1 = arith.constant 0 : i32
    return %c0_i32, %c0_i32_0 : i32, i32
  }
  func.func @transform_3(%arg0: i32) -> (i32, i32) {
    %c0_i32 = arith.constant 0 : i32
    %c0_i32_0 = arith.constant 0 : i32
    %c0_i32_1 = arith.constant 0 : i32
    return %c0_i32, %c0_i32_0 : i32, i32
  }
  func.func @transform_4(%arg0: i32) -> (i32, i32) {
    %c0_i32 = arith.constant 0 : i32
    %c0_i32_0 = arith.constant 0 : i32
    %c0_i32_1 = arith.constant 0 : i32
    return %c0_i32, %c0_i32_0 : i32, i32
  }
  func.func @transform_5(%arg0: i32) -> (i32, i32) {
    %c0_i32 = arith.constant 0 : i32
    %c0_i32_0 = arith.constant 0 : i32
    %c0_i32_1 = arith.constant 0 : i32
    return %c0_i32, %c0_i32_0 : i32, i32
  }
  func.func @transform_6(%arg0: i32) -> (i32, i32) {
    %c0_i32 = arith.constant 0 : i32
    %c0_i32_0 = arith.constant 0 : i32
    %c0_i32_1 = arith.constant 0 : i32
    return %c0_i32, %c0_i32_0 : i32, i32
  }
  func.func @transform_7(%arg0: i32) -> (i32, i32) {
    %c0_i32 = arith.constant 0 : i32
    %c0_i32_0 = arith.constant 0 : i32
    return %arg0, %c0_i32 : i32, i32
  }
}

</mosaic_0001>

<bundles_post_ra>
// kernel: tpu_custom_call.1
= control target key start
LH: loop header
LB: loop body
LE: loop exit
PB: predicated region body
PF: predicated region fallthrough
CT: control target
= control target key end

     0   :  { %12 = vsyncpa [#allocation3], 0  ;;  %s778_s0 = inlined_call_operand.hbm [shape: f32[8,20], index: 0, kind: input, shape index: {}]   ;;  %s779_s1 = inlined_call_operand.hbm [shape: bf16[20,64], index: 1, kind: input, shape index: {}]   ;;  %s780_s2 = inlined_call_operand.hbm [shape: f32[1,64], index: 2, kind: input, shape index: {}]   ;;  %s781_s3 = inlined_call_operand.hbm [shape: bf16[64,32], index: 3, kind: input, shape index: {}]   ;;  %s782_s4 = inlined_call_operand.hbm [shape: f32[1,32], index: 4, kind: input, shape index: {}]   ;;  %s783_s5 = inlined_call_operand.hbm [shape: bf16[32,8], index: 5, kind: input, shape index: {}]   ;;  %s784_s6 = inlined_call_operand.hbm [shape: f32[1,8], index: 6, kind: input, shape index: {}]   ;;  %s785_s7 = inlined_call_operand.hbm [shape: bf16[8,8], index: 7, kind: output, shape index: {}]  }
   0x1   :  { %13 = vsyncpa [#allocation6], 0 }
   0x2   :  { %14 = vsyncpa [#allocation9], 0 }
   0x3   :  { %15 = vsyncpa [#allocation12], 0 }
   0x4   :  { %16 = vsyncpa [#allocation4], 0  ;;  %s618_s24 = smov [#allocation5]   ;;  %s432_s28 = scalar_lea.hbm %s779_s1, 192 }
   0x5   :  { %s32_s25 = sshll.u32 %s618_s24, 4  ;;  %p433_p0 = scmp.ne.s32.totalorder %s779_s1, %s432_s28  ;;  %s33_s25 = int_to_ptr.vmem [resolvable:$true] %s32_s25 }
   0x6   :  { %p436_p1 = scmp.lt.u32.totalorder %s432_s28, %s779_s1 }
   0x8   :  { %p438_p2 = pnand %p436_p1, %p433_p0 }
   0xa   :  { %441 = shalt.err (!%p438_p2)
}
   0xb   :  { %s442_s10 = scalar_lea.vmem %s33_s25, 192  ;;  %p447_p4 = scmp.lt.s32.totalorder %s33_s25, %s33_s25 }
   0xc   :  { %p443_p3 = scmp.ne.s32.totalorder %s33_s25, %s442_s10  ;;  %p448_p5 = scmp.lt.s32.totalorder %s442_s10, %s442_s10 }
   0xe   :  { %p449_p6 = por %p448_p5, %p447_p4 }
  0x10   :  { %p450_p7 = pnand %p449_p6, %p443_p3 }
  0x12   :  { %453 = shalt.err (!%p450_p7)
}
  0x13   :  { %s619_s11 = smov 64   ;;  %s620_s12 = smov 4  }
  0x14   :  { %38 = dma.hbm_to_vmem [thread:$0]  %s779_s1, 192, %s33_s25, [#allocation6], %s619_s11, %s619_s11, %s620_s12  }
  0x15   :  { %s621_s15 = smov [#allocation8]   ;;  %s622_s17 = smov [#allocation11]  }
  0x16   :  { %s54_s16 = sshll.u32 %s621_s15, 4  ;;  %s76_s18 = sshll.u32 %s622_s17, 4  ;;  %s55_s16 = int_to_ptr.vmem [resolvable:$true] %s54_s16  ;;  %s77_s18 = int_to_ptr.vmem [resolvable:$true] %s76_s18 }
  0x17   :  { %s454_s21 = scalar_lea.hbm %s781_s3, 512 }
  0x18   :  { %p455_p8 = scmp.ne.s32.totalorder %s781_s3, %s454_s21  ;;  %p458_p9 = scmp.lt.u32.totalorder %s454_s21, %s781_s3 }
  0x1a   :  { %p460_p10 = pnand %p458_p9, %p455_p8 }
  0x1c   :  { %463 = shalt.err (!%p460_p10)
}
  0x1d   :  { %s464_s1 = scalar_lea.vmem %s55_s16, 512  ;;  %p469_p12 = scmp.lt.s32.totalorder %s55_s16, %s55_s16 }
  0x1e   :  { %p465_p11 = scmp.ne.s32.totalorder %s55_s16, %s464_s1  ;;  %p470_p13 = scmp.lt.s32.totalorder %s464_s1, %s464_s1 }
  0x20   :  { %p471_p0 = por %p470_p13, %p469_p12 }
  0x22   :  { %p472_p1 = pnand %p471_p0, %p465_p11 }
  0x24   :  { %475 = shalt.err (!%p472_p1)
}
  0x25   :  { %60 = dma.hbm_to_vmem [thread:$0]  %s781_s3, 512, %s55_s16, [#allocation9], %s619_s11, %s619_s11, %s620_s12  }
  0x26   :  { %s476_s30 = scalar_lea.hbm %s783_s5, 256 }
  0x27   :  { %p477_p2 = scmp.ne.s32.totalorder %s783_s5, %s476_s30  ;;  %p480_p3 = scmp.lt.u32.totalorder %s476_s30, %s783_s5 }
  0x29   :  { %p482_p4 = pnand %p480_p3, %p477_p2 }
  0x2b   :  { %485 = shalt.err (!%p482_p4)
}
  0x2c   :  { %s486_s14 = scalar_lea.vmem %s77_s18, 256  ;;  %p491_p6 = scmp.lt.s32.totalorder %s77_s18, %s77_s18 }
  0x2d   :  { %p487_p5 = scmp.ne.s32.totalorder %s77_s18, %s486_s14  ;;  %p492_p7 = scmp.lt.s32.totalorder %s486_s14, %s486_s14 }
  0x2f   :  { %p493_p8 = por %p492_p7, %p491_p6 }
  0x31   :  { %p494_p9 = pnand %p493_p8, %p487_p5 }
  0x33   :  { %497 = shalt.err (!%p494_p9)
}
  0x34   :  { %82 = dma.hbm_to_vmem [thread:$0]  %s783_s5, 256, %s77_s18, [#allocation12], %s619_s11, %s619_s11, %s620_s12  }
  0x35   :  { %s623_s16 = smov [#allocation2]   ;;  %s624_s19 = smov [#allocation7]  }
  0x36   :  { %s23_s17 = sshll.u32 %s623_s16, 4  ;;  %s45_s20 = sshll.u32 %s624_s19, 4  ;;  %s24_s17 = int_to_ptr.vmem [resolvable:$true] %s23_s17  ;;  %s46_s20 = int_to_ptr.vmem [resolvable:$true] %s45_s20 }
  0x37   :  { %s498_s23 = scalar_lea.hbm %s778_s0, 128 }
  0x38   :  { %p499_p10 = scmp.ne.s32.totalorder %s778_s0, %s498_s23  ;;  %p502_p11 = scmp.lt.u32.totalorder %s498_s23, %s778_s0 }
  0x3a   :  { %p504_p12 = pnand %p502_p11, %p499_p10 }
  0x3c   :  { %507 = shalt.err (!%p504_p12)
}
  0x3d   :  { %s508_s5 = scalar_lea.vmem %s24_s17, 128  ;;  %p513_p0 = scmp.lt.s32.totalorder %s24_s17, %s24_s17 }
  0x3e   :  { %p509_p13 = scmp.ne.s32.totalorder %s24_s17, %s508_s5  ;;  %p514_p1 = scmp.lt.s32.totalorder %s508_s5, %s508_s5 }
  0x40   :  { %p515_p2 = por %p514_p1, %p513_p0 }
  0x42   :  { %p516_p3 = pnand %p515_p2, %p509_p13 }
  0x44   :  { %519 = shalt.err (!%p516_p3)
}
  0x45   :  { %26 = dma.hbm_to_vmem [thread:$0]  %s778_s0, 128, %s24_s17, [#allocation3]  }
  0x46   :  { %s520_s28 = scalar_lea.hbm %s780_s2, 16 }
  0x47   :  { %p521_p4 = scmp.ne.s32.totalorder %s780_s2, %s520_s28  ;;  %p524_p5 = scmp.lt.u32.totalorder %s520_s28, %s780_s2 }
  0x49   :  { %p526_p6 = pnand %p524_p5, %p521_p4 }
  0x4b   :  { %529 = shalt.err (!%p526_p6)
}
  0x4c   :  { %s530_s10 = scalar_lea.vmem %s46_s20, 16  ;;  %s534_s13 = scalar_lea.vmem %s46_s20, 32 }
  0x4d   :  { %p531_p7 = scmp.ne.s32.totalorder %s46_s20, %s530_s10  ;;  %p535_p8 = scmp.lt.s32.totalorder %s46_s20, %s46_s20 }
  0x4e   :  { %p536_p9 = scmp.lt.s32.totalorder %s534_s13, %s530_s10 }
  0x50   :  { %p537_p10 = por %p536_p9, %p535_p8 }
  0x52   :  { %p538_p11 = pnand %p537_p10, %p531_p7 }
  0x54   :  { %541 = shalt.err (!%p538_p11)
}
  0x55   :  { %48 = dma.hbm_to_vmem [thread:$0]  %s780_s2, 16, %s46_s20, [#allocation6]  }
  0x56   :  { %s625_s3 = smov [#allocation10]   ;;  %s626_s16 = smov [#allocation13]  }
  0x57   :  { %s67_s15 = sshll.u32 %s625_s3, 4  ;;  %s89_s17 = sshll.u32 %s626_s16, 4  ;;  %s68_s15 = int_to_ptr.vmem [resolvable:$true] %s67_s15  ;;  %s90_s17 = int_to_ptr.vmem [resolvable:$true] %s89_s17 }
  0x58   :  { %s542_s22 = scalar_lea.hbm %s782_s4, 16 }
  0x59   :  { %p543_p12 = scmp.ne.s32.totalorder %s782_s4, %s542_s22  ;;  %p546_p13 = scmp.lt.u32.totalorder %s542_s22, %s782_s4 }
  0x5b   :  { %p548_p0 = pnand %p546_p13, %p543_p12 }
  0x5d   :  { %551 = shalt.err (!%p548_p0)
}
  0x5e   :  { %s552_s2 = scalar_lea.vmem %s68_s15, 16  ;;  %s556_s20 = scalar_lea.vmem %s68_s15, 32 }
  0x5f   :  { %p553_p1 = scmp.ne.s32.totalorder %s68_s15, %s552_s2  ;;  %p557_p2 = scmp.lt.s32.totalorder %s68_s15, %s68_s15 }
  0x60   :  { %p558_p3 = scmp.lt.s32.totalorder %s556_s20, %s552_s2 }
  0x62   :  { %p559_p4 = por %p558_p3, %p557_p2 }
  0x64   :  { %p560_p5 = pnand %p559_p4, %p553_p1 }
  0x66   :  { %563 = shalt.err (!%p560_p5)
}
  0x67   :  { %70 = dma.hbm_to_vmem [thread:$0]  %s782_s4, 16, %s68_s15, [#allocation9]  }
  0x68   :  { %s564_s18 = scalar_lea.hbm %s784_s6, 16 }
  0x69   :  { %p565_p6 = scmp.ne.s32.totalorder %s784_s6, %s564_s18  ;;  %p568_p7 = scmp.lt.u32.totalorder %s564_s18, %s784_s6 }
  0x6b   :  { %p570_p8 = pnand %p568_p7, %p565_p6 }
  0x6d   :  { %573 = shalt.err (!%p570_p8)
}
  0x6e   :  { %s574_s8 = scalar_lea.vmem %s90_s17, 16  ;;  %s578_s9 = scalar_lea.vmem %s90_s17, 32 }
  0x6f   :  { %p575_p9 = scmp.ne.s32.totalorder %s90_s17, %s574_s8  ;;  %p579_p10 = scmp.lt.s32.totalorder %s90_s17, %s90_s17 }
  0x70   :  { %p580_p11 = scmp.lt.s32.totalorder %s578_s9, %s574_s8 }
  0x72   :  { %p581_p12 = por %p580_p11, %p579_p10 }
  0x74   :  { %p582_p13 = pnand %p581_p12, %p575_p9 }
  0x76   :  { %585 = shalt.err (!%p582_p13)
}
  0x77   :  { %92 = dma.hbm_to_vmem [thread:$0]  %s784_s6, 16, %s90_s17, [#allocation12]  }
  0x78   :  { %608 = dma.done.wait [#allocation3], 128  }
  0x79   :  { %609 = vsyncadd [#allocation3], 4294967168 }
  0x7a   :  { %610 = dma.done.wait [#allocation6], 208  }
  0x7b   :  { %611 = vsyncadd [#allocation6], 4294967088 }
  0x7c   :  { %612 = dma.done.wait [#allocation9], 528  }
  0x7d   :  { %613 = vsyncadd [#allocation9], 4294966768 }
  0x7e   :  { %614 = dma.done.wait [#allocation12], 272  }
  0x7f   :  { %615 = vsyncadd [#allocation12], 4294967024  ;;  %v627_v0 = vmov 0.0   ;;  %vm628_vm0 = vmmov 0   ;;  %v424_v1 = vld [vmem:[#allocation5] sm:$0xff]   ;;  %vm140_vm1 = vcmask 1041408  }
  0x80   :  { %384 = vmatprep.subr.bf16.mxu0 %v627_v0  ;;  %388 = vmatprep.mubr.msk.bf16.mxu0 %vm628_vm0, %v627_v0  ;;  %v425_v2 = vld [vmem:[#allocation5 + $0x8] ss:$0 sps:$4 sm:$0x33]   ;;  %v115_v3 = vld [vmem:[#allocation2] sm:$0xff]  ;;  %v426_v4 = vld [vmem:[#allocation8] sm:$0xff]   ;;  %vm136_vm2 = vcmask 162816  }
  0x81   :  { %392 = vmatprep.subr.bf16.mxu1 %v627_v0  ;;  %400 = vmatprep.mubr.msk.bf16.mxu1 %vm628_vm0, %v627_v0  ;;  %v142_v5 = vsel %vm140_vm1, %v425_v2, 0  ;;  %v427_v6 = vld [vmem:[#allocation8 + $0x8] sm:$0xff]   ;;  %v116_v7 = vpack.c.bf16 %v115_v3, %v115_v3  ;;  %v428_v8 = vld [vmem:[#allocation8 + $0x10] sm:$0xff]   ;;  %v429_v9 = vld [vmem:[#allocation8 + $0x18] sm:$0xff]   ;;  %vm225_vm3 = vcmask 523264   ;;  %vm294_vm4 = vcmask 261120  }
  0x82   :  { %385 = vmatpush3.bf16.msra.mxu0 %v424_v1  ;;  %393 = vmatpush3.bf16.msra.mxu1 %v426_v4  ;;  %v430_v10 = vld [vmem:[#allocation11] sm:$0xff]   ;;  %v359_v11 = vld [vmem:[#allocation7] ss:$0 sm:$0xff]  ;;  %v431_v19 = vld [vmem:[#allocation11 + $0x8] sm:$0xff]   ;;  %s629_s6 = smov [#allocation14]   ;;  %vm339_vm5 = vcmask 60416  }
  0x83   :  { %386 = vmatprep.subr.bf16.mxu0 %v627_v0  ;;  %394 = vmatprep.subr.bf16.mxu1 %v627_v0  ;;  %v363_v20 = vld [vmem:[#allocation10] ss:$0 sm:$0xff]  ;;  %v369_v28 = vld [vmem:[#allocation13] ss:$0 sm:$0xff]  ;;  %s347_s13 = sshll.u32 %s629_s6, 4  ;;  %s348_s13 = int_to_ptr.vmem [resolvable:$true] %s347_s13 }
  0x84   :  { %s586_s0 = scalar_lea.vmem %s348_s13, 64  ;;  %p591_p1 = scmp.lt.s32.totalorder %s348_s13, %s348_s13 }
  0x85   :  { %p587_p0 = scmp.ne.s32.totalorder %s348_s13, %s586_s0  ;;  %p592_p2 = scmp.lt.s32.totalorder %s586_s0, %s586_s0 }
  0x86   :  { %387 = vmatpush3.bf16.msra.mxu0 %v142_v5  ;;  %395 = vmatpush3.bf16.msra.mxu1 %v427_v6 }
  0x87   :  { %404 = vmatprep.subr.bf16.mxu0 %v627_v0  ;;  %396 = vmatprep.subr.bf16.mxu1 %v627_v0  ;;  %p593_p3 = por %p592_p2, %p591_p1 }
  0x89   :  { %389 = vmatmul.mubr.msk.bf16.vlgmr.msra.gmra.mrb[0].mxu0 %vm136_vm2, %v116_v7  ;;  %p594_p4 = pnand %p593_p3, %p587_p0 }
  0x8a   :  { %408 = vmatprep.mubr.msk.bf16.mxu0 %vm628_vm0, %v627_v0  ;;  %397 = vmatpush3.bf16.msra.mxu1 %v428_v8 }
  0x8b   :  { %398 = vmatprep.subr.bf16.mxu1 %v627_v0  ;;  %405 = vmatpush3.bf16.msra.mxu0 %v430_v10 }
  0x8c   :  { %406 = vmatprep.subr.bf16.mxu0 %v627_v0 }
  0x8e   :  { %399 = vmatpush3.bf16.msra.mxu1 %v429_v9 }
  0x8f   :  { %407 = vmatpush3.bf16.msra.mxu0 %v431_v19 }
 0x15c   :  { %v178_v12 = vpop.f32.mrb[0].mxu0 }
 0x15d   :  { %v179_v13 = vadd.f32 %v359_v11, %v178_v12  ;;  %v390_v14 = vpop.f32.mrb[1].mxu0 }
 0x15e   :  { %v181_v15 = vpop.f32.mrb[2].mxu0 }
 0x15f   :  { %v184_v16 = vmax.f32 %v179_v13, 0.0  ;;  %v391_v17 = vpop.f32.mrb[3].mxu0 }
 0x161   :  { %v185_v18 = vpack.c.bf16 %v184_v16, %v184_v16 }
 0x163   :  { %401 = vmatmul.mubr.msk.bf16.vlgmr.msra.gmra.mrb[0].mxu1 %vm225_vm3, %v185_v18 }
 0x236   :  { %v263_v21 = vpop.f32.mrb[0].mxu1 }
 0x237   :  { %v264_v22 = vadd.f32 %v363_v20, %v263_v21  ;;  %v402_v23 = vpop.f32.mrb[1].mxu1 }
 0x238   :  { %v266_v24 = vpop.f32.mrb[2].mxu1 }
 0x239   :  { %v269_v25 = vmax.f32 %v264_v22, 0.0  ;;  %v403_v26 = vpop.f32.mrb[3].mxu1 }
 0x23b   :  { %v270_v27 = vpack.c.bf16 %v269_v25, %v269_v25 }
 0x23d   :  { %409 = vmatmul.mubr.msk.bf16.vlgmr.msra.gmra.mrb[4].mxu0 %vm294_vm4, %v270_v27 }
 0x310   :  { %v332_v29 = vpop.f32.mrb[4].mxu0 }
 0x311   :  { %v333_v30 = vadd.f32 %v369_v28, %v332_v29  ;;  %v410_v31 = vpop.f32.mrb[5].mxu0 }
 0x312   :  { %v335_v32 = vpop.f32.mrb[6].mxu0 }
 0x313   :  { %v338_v33 = vpack.c.bf16 %v333_v30, %v333_v30  ;;  %v411_v34 = vpop.f32.mrb[7].mxu0 }
 0x315   :  { %340 = vst.msk [vmem:[#allocation14] sm:$0xf] %vm339_vm5, %v338_v33 }
 0x316   :  { %597 = shalt.err (!%p594_p4)
}
 0x317   :  { %s598_s15 = scalar_lea.hbm %s785_s7, 64 }
 0x318   :  { %p599_p5 = scmp.ne.s32.totalorder %s785_s7, %s598_s15  ;;  %p602_p6 = scmp.lt.u32.totalorder %s598_s15, %s785_s7 }
 0x31a   :  { %p604_p7 = pnand %p602_p6, %p599_p5 }
 0x31c   :  { %607 = shalt.err (!%p604_p7)
}
 0x31d   :  { %350 = dma.vmem_to_hbm [thread:$0]  %s348_s13, 64, %s785_s7, [#allocation4]  }
 0x31e   :  { %616 = dma.done.wait [#allocation4], 64  }
 0x31f   :  { %617 = vsyncadd [#allocation4], 4294967232 }
 0x320   :  { %354 = vsyncpa [#allocation3], 1 }
 0x321   :  { %355 = vsyncpa [#allocation6], 1 }
 0x322   :  { %356 = vsyncpa [#allocation9], 1 }
 0x323   :  { %357 = vsyncpa [#allocation12], 1 }
 0x324   :  { %358 = vsyncpa [#allocation4], 1 }

</bundles_post_ra>
